<compile_context>
chip_gen: v6e
topology: v6e:2x2x1
jax: 0.10.0
libtpu: 0.0.40
codegen_flags: <defaults>
</compile_context>

<pallas_src>
import jax
import jax.numpy as jnp
from jax.experimental import pallas as pl
from jax.experimental.pallas import tpu as pltpu


def mlp_kernel(x_ref, w1_ref, b1_ref, w2_ref, b2_ref, o_ref):
    # x_ref : (TB, IN)   input tile, native (batch, feature) layout
    # w1_ref: (HID, IN)  linear1 weight (PyTorch layout), grid-resident
    # b1_ref: (HID, 1)   linear1 bias as a column, grid-resident
    # w2_ref: (HID, 1)   linear2 weight as a column, grid-resident
    # b2_ref: (1, 1)     linear2 bias, scalar in SMEM
    # o_ref : (1, TB)    lane-dense output tile
    #
    # h = W1 @ x^T via dot_general contracting the IN axes -> (HID, TB);
    # batch stays on lanes, so no wrapper transpose and an unmasked store.
    h = jax.lax.dot_general(
        w1_ref[...], x_ref[...],
        dimension_numbers=(((1,), (1,)), ((), ())),
        preferred_element_type=jnp.float32)                   # MXU
    h = jnp.maximum(h + b1_ref[...], 0.0)                     # bias + ReLU (VPU)
    # linear2 (out_features == 1): VPU mul + XLU sublane reduce instead of a
    # 1-column MXU pass; result is already lane-dense (1, TB).
    z = jnp.sum(h * w2_ref[...], axis=0, keepdims=True) + b2_ref[0, 0]
    o_ref[...] = jax.nn.sigmoid(z).astype(o_ref.dtype)        # EUP


def neural_net_forward(x, w1, b1, w2, b2, *, batch_tile=16384):
    """Forward pass of NeuralNet.

    x : (B, input_size)        float32
    w1: (hidden, input_size)   PyTorch nn.Linear weight layout
    b1: (hidden,)
    w2: (1, hidden)
    b2: (1,)
    returns (B, 1) float32
    """
    B, in_size = x.shape
    hid = w1.shape[0]

    # --- batch tile selection -------------------------------------------
    # Budget double-buffered (x tile + out tile) against the most constrained
    # generation (v7x: 64 MiB physical / 32 MiB scoped default): keep it under
    # ~24 MiB regardless of in_size.
    vmem_budget = 24 << 20
    tb_cap = max(128, ((vmem_budget // (2 * 4 * (in_size + 1))) // 128) * 128)

    if B <= 256:
        # Small batch: one tile covering the whole batch (block == full array,
        # so non-multiple-of-128 B is legal; just a masked store, irrelevant
        # at this size).
        tb = min(B, tb_cap)
    else:
        # Large batch: MiB-scale tiles, but keep >= 2 grid steps so the
        # "parallel" batch axis can shard across v7x's two TensorCores.
        half = ((-(-B // 2)) + 127) // 128 * 128   # cdiv(B, 2) rounded up to 128
        tb = min(batch_tile, half, tb_cap)
    n_tiles = pl.cdiv(B, tb)

    # --- VMEM limit (only matters for very large tiles, esp. on v5e) -----
    x_tile_bytes = tb * in_size * 4
    weights_bytes = 4 * (hid * in_size + 3 * hid + 1)
    vmem_needed = 2 * (x_tile_bytes + tb * 4) + 2 * weights_bytes
    compiler_kwargs = dict(dimension_semantics=("parallel",))
    if vmem_needed > (14 << 20):   # v5e scoped-VMEM default is 16 MiB
        compiler_kwargs["vmem_limit_bytes"] = int(
            min(vmem_needed * 5 // 4 + (2 << 20), 48 << 20))
    compiler_params = pltpu.CompilerParams(**compiler_kwargs)

    b1c = b1.reshape(hid, 1)                    # column bias
    w2c = w2.reshape(hid, 1)                    # (1, hid) -> (hid, 1)
    b2s = b2.reshape(1, 1)                      # scalar for SMEM

    out = pl.pallas_call(
        mlp_kernel,
        out_shape=jax.ShapeDtypeStruct((1, B), jnp.float32),
        grid=(n_tiles,),
        in_specs=[
            pl.BlockSpec((tb, in_size), lambda i: (i, 0)),      # x tile, native layout
            pl.BlockSpec((hid, in_size), lambda i: (0, 0)),     # W1 resident
            pl.BlockSpec((hid, 1), lambda i: (0, 0)),           # b1 resident
            pl.BlockSpec((hid, 1), lambda i: (0, 0)),           # W2 resident
            pl.BlockSpec(memory_space=pltpu.MemorySpace.SMEM),  # b2 scalar
        ],
        out_specs=pl.BlockSpec((1, tb), lambda i: (0, i)),
        compiler_params=compiler_params,
    )(x, w1, b1c, w2c, b2s)

    # (1, B) lane-dense slab -> (B, 1).
    return out.T


if __name__ == "__main__":
    input_size, hidden_size, batch = 32, 32, 8

    key = jax.random.PRNGKey(0)
    kx, k1, k2, k3, k4 = jax.random.split(key, 5)

    # Deterministic parameter init, PyTorch nn.Linear layouts: W (out, in), b (out,)
    bound1 = 1.0 / jnp.sqrt(jnp.float32(input_size))
    bound2 = 1.0 / jnp.sqrt(jnp.float32(hidden_size))
    w1 = jax.random.uniform(k1, (hidden_size, input_size), jnp.float32, -bound1, bound1)
    b1 = jax.random.uniform(k2, (hidden_size,), jnp.float32, -bound1, bound1)
    w2 = jax.random.uniform(k3, (1, hidden_size), jnp.float32, -bound2, bound2)
    b2 = jax.random.uniform(k4, (1,), jnp.float32, -bound2, bound2)

    x = jax.random.normal(kx, (batch, input_size), jnp.float32)

    y = neural_net_forward(x, w1, b1, w2, b2)
    jax.block_until_ready(y)

    # Reference check in plain JAX (matches the PyTorch forward).
    ref = jax.nn.sigmoid(jnp.maximum(x @ w1.T + b1, 0.0) @ w2.T + b2)
    assert y.shape == (batch, 1)
    assert jnp.allclose(y, ref, atol=1e-5), "mismatch vs reference"

    print("KERNEL_OK")
</pallas_src>

<mosaic_0001>
module attributes {stable_mosaic.version = 11 : i64} {
  func.func @mlp_kernel(%arg0: i32, %arg1: memref<8x32xf32, #tpu.memory_space<vmem>>, %arg2: memref<32x32xf32, #tpu.memory_space<vmem>>, %arg3: memref<32x1xf32, #tpu.memory_space<vmem>>, %arg4: memref<32x1xf32, #tpu.memory_space<vmem>>, %arg5: memref<1x1xf32, #tpu.memory_space<smem>>, %arg6: memref<1x8xf32, #tpu.memory_space<vmem>>) attributes {dimension_semantics = [#tpu.dimension_semantics<parallel>], iteration_bounds = array<i64: 1>, scalar_prefetch = 0 : i64, scratch_operands = 0 : i64, tpu.core_type = #tpu.core_type<tc>, window_params = [{transform_indices = @transform_0, window_bounds = array<i64: 8, 32>}, {pipeline_mode = #tpu.pipeline_mode<synchronous>, transform_indices = @transform_1, window_bounds = array<i64: 32, 32>}, {pipeline_mode = #tpu.pipeline_mode<synchronous>, transform_indices = @transform_2, window_bounds = array<i64: 32, 1>}, {pipeline_mode = #tpu.pipeline_mode<synchronous>, transform_indices = @transform_3, window_bounds = array<i64: 32, 1>}, {transform_indices = @transform_4, window_bounds = array<i64: 1, 1>}, {transform_indices = @transform_5, window_bounds = array<i64: 1, 8>}]} {
    %c0 = arith.constant 0 : index
    %c0_0 = arith.constant 0 : index
    %0 = vector.load %arg2[%c0, %c0_0] : memref<32x32xf32, #tpu.memory_space<vmem>>, vector<32x32xf32>
    %c0_1 = arith.constant 0 : index
    %c0_2 = arith.constant 0 : index
    %1 = vector.load %arg1[%c0_1, %c0_2] : memref<8x32xf32, #tpu.memory_space<vmem>>, vector<8x32xf32>
    %cst = arith.constant dense<0.000000e+00> : vector<32x8xf32>
    %2 = tpu.matmul %0, %1, %cst {dimension_numbers = #tpu.dot_dimension_numbers<[1], [1], [0], [0], [0, 0, 1, 0], [], []>} : vector<32x32xf32>, vector<8x32xf32>, vector<32x8xf32> -> vector<32x8xf32>
    %c0_3 = arith.constant 0 : index
    %c0_4 = arith.constant 0 : index
    %3 = vector.load %arg3[%c0_3, %c0_4] : memref<32x1xf32, #tpu.memory_space<vmem>>, vector<32x1xf32>
    %4 = vector.broadcast %3 : vector<32x1xf32> to vector<32x8xf32>
    %5 = arith.addf %2, %4 : vector<32x8xf32>
    %cst_5 = arith.constant 0.000000e+00 : f32
    %6 = vector.broadcast %cst_5 : f32 to vector<32x8xf32>
    %7 = arith.maximumf %5, %6 : vector<32x8xf32>
    %c0_6 = arith.constant 0 : index
    %c0_7 = arith.constant 0 : index
    %8 = vector.load %arg4[%c0_6, %c0_7] : memref<32x1xf32, #tpu.memory_space<vmem>>, vector<32x1xf32>
    %9 = vector.broadcast %8 : vector<32x1xf32> to vector<32x8xf32>
    %10 = arith.mulf %7, %9 : vector<32x8xf32>
    %cst_8 = arith.constant dense<0.000000e+00> : vector<8xf32>
    %11 = vector.multi_reduction <add>, %10, %cst_8 [0] : vector<32x8xf32> to vector<8xf32>
    %12 = vector.shape_cast %11 : vector<8xf32> to vector<1x8xf32>
    %c0_9 = arith.constant 0 : index
    %c0_10 = arith.constant 0 : index
    %13 = memref.load %arg5[%c0_9, %c0_10] : memref<1x1xf32, #tpu.memory_space<smem>>
    %14 = vector.broadcast %13 : f32 to vector<1x8xf32>
    %15 = arith.addf %12, %14 : vector<1x8xf32>
    %16 = arith.negf %15 : vector<1x8xf32>
    %17 = math.exp %16 : vector<1x8xf32>
    %cst_11 = arith.constant 1.000000e+00 : f32
    %18 = vector.broadcast %cst_11 : f32 to vector<1x8xf32>
    %19 = arith.addf %18, %17 : vector<1x8xf32>
    %20 = arith.divf %18, %19 : vector<1x8xf32>
    %c0_12 = arith.constant 0 : index
    %c0_13 = arith.constant 0 : index
    %21 = vector.load %arg6[%c0_12, %c0_13] : memref<1x8xf32, #tpu.memory_space<vmem>>, vector<1x8xf32>
    tpu.vector_store %arg6[%c0_12, %c0_13], %20 {strides = array<i32>} : memref<1x8xf32, #tpu.memory_space<vmem>>, vector<1x8xf32>,
    return
  }
  func.func @transform_0(%arg0: i32) -> (i32, i32) {
    %c0_i32 = arith.constant 0 : i32
    %c0_i32_0 = arith.constant 0 : i32
    return %arg0, %c0_i32 : i32, i32
  }
  func.func @transform_1(%arg0: i32) -> (i32, i32) {
    %c0_i32 = arith.constant 0 : i32
    %c0_i32_0 = arith.constant 0 : i32
    %c0_i32_1 = arith.constant 0 : i32
    return %c0_i32, %c0_i32_0 : i32, i32
  }
  func.func @transform_2(%arg0: i32) -> (i32, i32) {
    %c0_i32 = arith.constant 0 : i32
    %c0_i32_0 = arith.constant 0 : i32
    %c0_i32_1 = arith.constant 0 : i32
    return %c0_i32, %c0_i32_0 : i32, i32
  }
  func.func @transform_3(%arg0: i32) -> (i32, i32) {
    %c0_i32 = arith.constant 0 : i32
    %c0_i32_0 = arith.constant 0 : i32
    %c0_i32_1 = arith.constant 0 : i32
    return %c0_i32, %c0_i32_0 : i32, i32
  }
  func.func @transform_4(%arg0: i32) -> (i32, i32) {
    %c0_i32 = arith.constant 0 : i32
    %c0_i32_0 = arith.constant 0 : i32
    %c0_i32_1 = arith.constant 0 : i32
    return %c0_i32, %c0_i32_0 : i32, i32
  }
  func.func @transform_5(%arg0: i32) -> (i32, i32) {
    %c0_i32 = arith.constant 0 : i32
    %c0_i32_0 = arith.constant 0 : i32
    return %c0_i32, %arg0 : i32, i32
  }
}

</mosaic_0001>

<bundles_post_ra>
// kernel: tpu_custom_call.1
= control target key start
LH: loop header
LB: loop body
LE: loop exit
PB: predicated region body
PF: predicated region fallthrough
CT: control target
= control target key end

     0   :  { %vm51_vm0 = vcmask 261120   ;;  %v274_v7 = vmov 0   ;;  %s359_s0 = inlined_call_operand.vmem [shape: f32[8,32], index: 0, kind: input, shape index: {}]   ;;  %s360_s1 = inlined_call_operand.vmem [shape: f32[32,32], index: 1, kind: input, shape index: {}]   ;;  %s361_s2 = inlined_call_operand.vmem [shape: f32[32,1], index: 2, kind: input, shape index: {}]   ;;  %s362_s3 = inlined_call_operand.vmem [shape: f32[32,1], index: 3, kind: input, shape index: {}]   ;;  %s363_s4 = inlined_call_operand.<no memory space> [shape: f32[1,1], index: 4, kind: input, shape index: {}]   ;;  %s364_s5 = inlined_call_operand.hbm [shape: f32[1,8], index: 5, kind: output, shape index: {}]  }
   0x1   :  { %v26_v0 = vld [vmem:[%s359_s0] sm:$0xff]  ;;  %v24_v2 = vld [vmem:[%s360_s1 + $0x10] sm:$0xff]  ;;  %v23_v3 = vld [vmem:[%s360_s1 + $0x8] sm:$0xff]  ;;  %246 = vset.pattern.permute.xlu0 %v274_v7  ;;  %247 = vset.pattern.permute.xlu1 %v274_v7 }
   0x2   :  { %v22_v1 = vld [vmem:[%s360_s1] sm:$0xff]  ;;  %234 = vmatprep.subr.msk.mxu0 %vm51_vm0, %v26_v0  ;;  %242 = vmatprep.subr.msk.mxu1 %vm51_vm0, %v26_v0  ;;  %v25_v4 = vld [vmem:[%s360_s1 + $0x18] sm:$0xff]  ;;  %v29_v6 = vld [vmem:[%s361_s2 + $0x10] sm:$0xff] }
   0x3   :  { %235 = vmatpush3.xpose.msk.msra.mxu0 %vm51_vm0, %v26_v0  ;;  %243 = vmatpush3.xpose.msk.msra.mxu1 %vm51_vm0, %v26_v0  ;;  %v27_v5 = vld [vmem:[%s361_s2] sm:$0xff] }
   0x4   :  { %236 = vmatprep.mubr.msk.f32.mxu0 %vm51_vm0, %v22_v1  ;;  %239 = vmatprep.mubr.msk.f32.mxu1 %vm51_vm0, %v24_v2 }
   0x5   :  { %11 = vsyncpa [#allocation4], 0  ;;  %33 = vperm.xlu0 %246, %v27_v5   ;;  %43 = vperm.xlu1 %247, %v29_v6   ;;  %v28_v8 = vld [vmem:[%s361_s2 + $0x8] sm:$0xff]  ;;  %v30_v9 = vld [vmem:[%s361_s2 + $0x18] sm:$0xff]  ;;  %vm184_vm1 = vcmask 64512   ;;  %v199_v50 = vstv %s363_s4  ;;  %s275_s17 = smov [#allocation3]  }
   0x6   :  { %237 = vmatmul.mubr.msk.f32.vlgmr.msra.gmra.mxu0 %vm51_vm0, %v23_v3  ;;  %240 = vmatmul.mubr.msk.f32.vlgmr.msra.gmra.mxu1 %vm51_vm0, %v25_v4  ;;  %v156_v10 = vld [vmem:[%s362_s3] sm:$0xff]  ;;  %v157_v11 = vld [vmem:[%s362_s3 + $0x8] sm:$0xff]  ;;  %v158_v12 = vld [vmem:[%s362_s3 + $0x10] sm:$0xff]  ;;  %s215_s18 = sshll.u32 %s275_s17, 4  ;;  %vm207_vm2 = vcmask 57344   ;;  %s216_s18 = int_to_ptr.vmem [resolvable:$true] %s215_s18 }
   0x7   :  { %v159_v13 = vld [vmem:[%s362_s3 + $0x18] sm:$0xff]  ;;  %s252_s19 = scalar_lea.vmem %s216_s18, 16  ;;  %s256_s20 = scalar_lea.vmem %s216_s18, 32 }
   0x8   :  { %p253_p0 = scmp.ne.s32.totalorder %s216_s18, %s252_s19  ;;  %p257_p1 = scmp.lt.s32.totalorder %s216_s18, %s216_s18 }
   0x9   :  { %38 = vperm.xlu0 %246, %v28_v8   ;;  %48 = vperm.xlu1 %247, %v30_v9   ;;  %p258_p2 = scmp.lt.s32.totalorder %s256_s20, %s252_s19 }
   0xb   :  { %p259_p3 = por %p258_p2, %p257_p1 }
   0xd   :  { %162 = vperm.xlu0 %246, %v156_v10   ;;  %167 = vperm.xlu1 %247, %v157_v11   ;;  %p260_p4 = pnand %p259_p3, %p253_p0 }
  0x11   :  { %172 = vperm.xlu0 %246, %v158_v12   ;;  %177 = vperm.xlu1 %247, %v159_v13  }
  0x80   :  { %v34_v14 = vpop.permute.xlu0 %33  ;;  %v44_v15 = vpop.permute.xlu1 %43 }
  0x84   :  { %v39_v16 = vpop.permute.xlu0 %38  ;;  %v49_v17 = vpop.permute.xlu1 %48 }
  0x88   :  { %v163_v18 = vpop.permute.xlu0 %162  ;;  %v168_v21 = vpop.permute.xlu1 %167 }
  0x8c   :  { %v173_v33 = vpop.permute.xlu0 %172  ;;  %v178_v36 = vpop.permute.xlu1 %177 }
  0xc6   :  { %v238_v19 = vpop.f32.mrf.mxu0  ;;  %v241_v20 = vpop.f32.mrf.mxu1 }
  0xc7   :  { %v139_v22 = vadd.f32 %v238_v19, %v39_v16  ;;  %v149_v23 = vadd.f32 %v241_v20, %v49_v17 }
  0xc8   :  { %v133_v24 = vpop.f32.mrf.mxu0  ;;  %v143_v25 = vpop.f32.mrf.mxu1 }
  0xc9   :  { %v153_v26 = vmax.f32 %v139_v22, 0.0  ;;  %v134_v27 = vadd.f32 %v133_v24, %v34_v14  ;;  %v144_v28 = vadd.f32 %v143_v25, %v44_v15  ;;  %v155_v30 = vmax.f32 %v149_v23, 0.0 }
  0xcb   :  { %v181_v29 = vmul.f32 %v168_v21, %v153_v26  ;;  %v152_v31 = vmax.f32 %v134_v27, 0.0  ;;  %v154_v32 = vmax.f32 %v144_v28, 0.0  ;;  %v183_v38 = vmul.f32 %v178_v36, %v155_v30 }
  0xcd   :  { %v180_v34 = vmul.f32 %v163_v18, %v152_v31  ;;  %v182_v35 = vmul.f32 %v173_v33, %v154_v32  ;;  %v186_v37 = vsel %vm184_vm1, %v181_v29, 0.0  ;;  %v190_v43 = vsel %vm184_vm1, %v183_v38, 0.0 }
  0xcf   :  { %v185_v39 = vsel %vm184_vm1, %v180_v34, 0.0  ;;  %v188_v41 = vsel %vm184_vm1, %v182_v35, 0.0 }
  0xd0   :  { %v187_v40 = vadd.f32 %v186_v37, %v185_v39 }
  0xd2   :  { %v189_v42 = vadd.f32 %v188_v41, %v187_v40 }
  0xd4   :  { %v191_v44 = vadd.f32 %v190_v43, %v189_v42 }
  0xd6   :  { %v192_v45 = vrot.slane %v191_v44, 4 }
  0xd8   :  { %v193_v46 = vadd.f32 %v192_v45, %v191_v44 }
  0xda   :  { %v194_v47 = vrot.slane %v193_v46, 2 }
  0xdc   :  { %v195_v48 = vadd.f32 %v194_v47, %v193_v46 }
  0xde   :  { %v196_v49 = vrot.slane %v195_v48, 1 }
  0xe0   :  { %v197_v51 = vadd.f32 %v196_v49, %v195_v48 }
  0xe2   :  { %v200_v52 = vadd.f32 %v199_v50, %v197_v51 }
  0xe4   :  { %v228_v53 = vmul.f32 -1.442695, %v200_v52 }
  0xe6   :  { %248 = vpow2.f32 %v228_v53 }
  0xf3   :  { %v249_v54 = vpop.eup %248 }
  0xf4   :  { %v204_v55 = vadd.f32 1.0, %v249_v54 }
  0xf6   :  { %250 = vrcp.f32 %v204_v55 }
 0x103   :  { %v251_v56 = vpop.eup %250 }
 0x104   :  { %208 = vst.msk [vmem:[#allocation3] sm:$0x1] %vm207_vm2, %v251_v56 }
 0x105   :  { %263 = shalt.err (!%p260_p4)
}
 0x106   :  { %218 = dma.vmem_to_hbm [thread:$0]  %s216_s18, 16, %s364_s5, [#allocation4]  }
 0x107   :  { %272 = dma.done.wait [#allocation4], 16  }
 0x108   :  { %273 = vsyncadd [#allocation4], 4294967280 }
 0x109   :  { %222 = vsyncpa [#allocation4], 1 }

</bundles_post_ra>
